<compile_context>
chip_gen: v5e
topology: v5e:2x2
jax: 0.10.0
libtpu: 0.0.40
codegen_flags: <defaults>
</compile_context>

<pallas_src>
import functools

import jax
import jax.numpy as jnp
from jax.experimental import pallas as pl
from jax.experimental.pallas import tpu as pltpu


def _round_up(x, m):
    return (x + m - 1) // m * m


def classifier_kernel(x_ref, w1_ref, b1_ref, w2_ref, b2_ref, lbl_ref,
                      logits_ref, loss_ref, pooled_acc,
                      *, num_classes, inv_seq_len):
    si = pl.program_id(1)

    @pl.when(si == 0)
    def _init():
        pooled_acc[...] = jnp.zeros_like(pooled_acc)

    # Streamed mean-pool: accumulate the seq-chunk sum in f32.
    pooled_acc[...] += jnp.sum(x_ref[...].astype(jnp.float32), axis=1)

    @pl.when(si == pl.num_programs(1) - 1)
    def _finalize():
        # bf16 MXU operands, f32 accumulation.
        pooled = (pooled_acc[...] * inv_seq_len).astype(jnp.bfloat16)

        # Dense(D -> H_pad) + tanh-GELU (f32 elementwise).
        h = jnp.dot(pooled, w1_ref[...],
                    preferred_element_type=jnp.float32) + b1_ref[...]
        h2 = h * h
        h = 0.5 * h * (1.0 + jnp.tanh(0.7978845608028654 *
                                      (h + 0.044715 * (h2 * h))))

        # Dense(H_pad -> C_pad); padded weight cols are zero.
        logits = jnp.dot(h.astype(jnp.bfloat16), w2_ref[...],
                         preferred_element_type=jnp.float32) + b2_ref[...]
        logits_ref[...] = logits                       # lane-dense [TILE_B, C_pad]

        # Cross-entropy over the real classes only (mask padded columns).
        col = jax.lax.broadcasted_iota(jnp.int32, logits.shape, 1)
        masked = jnp.where(col < num_classes, logits, jnp.float32(-1e30))
        m = jnp.max(masked, axis=-1, keepdims=True)
        lse = jnp.log(jnp.sum(jnp.exp(masked - m), axis=-1, keepdims=True)) + m

        # In-register one-hot via iota compare (labels always < num_classes).
        onehot = (col == lbl_ref[...]).astype(jnp.float32)
        label_logit = jnp.sum(logits * onehot, axis=-1, keepdims=True)

        per_example = lse - label_logit                # [TILE_B, 1]
        loss_ref[...] = jnp.broadcast_to(per_example, loss_ref.shape)


def classifier_forward(input_ids, labels, params):
    """Embedding gather (bf16) + one-hot-free Pallas classifier kernel."""
    emb, w1, b1, w2, b2 = (params["emb"], params["w1"], params["b1"],
                           params["w2"], params["b2"])
    B, S = input_ids.shape
    D = emb.shape[1]
    H = w1.shape[1]
    C = w2.shape[1]

    H_pad = _round_up(H, 128)
    C_pad = _round_up(C, 128)

    # Tile sizes: batch tile parallel across TCs, seq chunked for streaming.
    TILE_B = min(128, _round_up(B, 8))
    B_pad = _round_up(B, TILE_B)
    TILE_S = 8 if S <= 128 else 128
    S_pad = _round_up(S, TILE_S)
    NB = B_pad // TILE_B
    NS = S_pad // TILE_S

    # Pad weights/biases to lane-dense shapes (zeros -> matmul unaffected).
    w1_p = jnp.zeros((D, H_pad), jnp.bfloat16).at[:, :H].set(w1.astype(jnp.bfloat16))
    b1_p = jnp.zeros((1, H_pad), jnp.float32).at[:, :H].set(b1.astype(jnp.float32))
    w2_p = jnp.zeros((H_pad, C_pad), jnp.bfloat16).at[:H, :C].set(w2.astype(jnp.bfloat16))
    b2_p = jnp.zeros((1, C_pad), jnp.float32).at[:, :C].set(b2.astype(jnp.float32))

    # Embedding gather in bf16 (halves HBM traffic into the kernel).
    ids = input_ids
    lbl = labels
    if B_pad != B:
        ids = jnp.pad(ids, ((0, B_pad - B), (0, 0)))
        lbl = jnp.pad(lbl, (0, B_pad - B))
    x = jnp.take(emb.astype(jnp.bfloat16), ids, axis=0)         # [B_pad, S, D]
    if S_pad != S:
        # zero-padded positions contribute 0 to the sum; divide by true S.
        x = jnp.pad(x, ((0, 0), (0, S_pad - S), (0, 0)))
    lbl_2d = lbl.reshape(B_pad, 1).astype(jnp.int32)

    kernel = functools.partial(classifier_kernel,
                               num_classes=C, inv_seq_len=1.0 / S)

    # VMEM budget for the chosen tiles (double-buffered x, weights, outputs,
    # scratch) with headroom; capped so it also fits v7x's 64 MiB VMEM.
    tile_bytes = (2 * TILE_B * TILE_S * D * 2
                  + (D * H_pad + H_pad * C_pad) * 2
                  + (H_pad + C_pad) * 4
                  + 2 * TILE_B * 4
                  + TILE_B * (C_pad + 128) * 4
                  + TILE_B * max(D, 128) * 4)
    vmem_limit = int(min(max(4 * tile_bytes, 16 * 2**20), 48 * 2**20))

    cost = pl.CostEstimate(
        flops=2 * B_pad * (S_pad * D + D * H_pad + H_pad * C_pad),
        transcendentals=B_pad * (H_pad + C_pad),
        bytes_accessed=(B_pad * S_pad * D * 2
                        + (D * H_pad + H_pad * C_pad) * 2
                        + (H_pad + C_pad) * 4
                        + B_pad * 4
                        + B_pad * (C_pad + 128) * 4),
    )

    grid_spec = pltpu.PrefetchScalarGridSpec(
        num_scalar_prefetch=0,
        grid=(NB, NS),
        in_specs=[
            pl.BlockSpec((TILE_B, TILE_S, D), lambda bi, si: (bi, si, 0)),  # x
            pl.BlockSpec((D, H_pad), lambda bi, si: (0, 0)),                # w1
            pl.BlockSpec((1, H_pad), lambda bi, si: (0, 0)),                # b1
            pl.BlockSpec((H_pad, C_pad), lambda bi, si: (0, 0)),            # w2
            pl.BlockSpec((1, C_pad), lambda bi, si: (0, 0)),                # b2
            pl.BlockSpec((TILE_B, 1), lambda bi, si: (bi, 0)),              # labels
        ],
        out_specs=[
            pl.BlockSpec((TILE_B, C_pad), lambda bi, si: (bi, 0)),          # logits
            pl.BlockSpec((TILE_B, 128), lambda bi, si: (bi, 0)),            # per-ex loss
        ],
        scratch_shapes=[pltpu.VMEM((TILE_B, D), jnp.float32)],
    )

    logits_p, loss_p = pl.pallas_call(
        kernel,
        grid_spec=grid_spec,
        out_shape=(
            jax.ShapeDtypeStruct((B_pad, C_pad), jnp.float32),
            jax.ShapeDtypeStruct((B_pad, 128), jnp.float32),
        ),
        compiler_params=pltpu.CompilerParams(
            dimension_semantics=("parallel", "arbitrary"),
            vmem_limit_bytes=vmem_limit),
        cost_estimate=cost,
    )(x, w1_p, b1_p, w2_p, b2_p, lbl_2d)

    logits = logits_p[:B, :C]
    loss = jnp.mean(loss_p[:B, 0])
    return {"logits": logits, "loss": loss}


def _ref_forward(input_ids, labels, params):
    """Pure-JAX f32 reference for a sanity check."""
    emb, w1, b1, w2, b2 = (params["emb"], params["w1"], params["b1"],
                           params["w2"], params["b2"])
    x = jnp.take(emb, input_ids, axis=0).astype(jnp.float32)
    pooled = jnp.mean(x, axis=1)
    h = pooled @ w1 + b1
    h = 0.5 * h * (1.0 + jnp.tanh(0.7978845608028654 * (h + 0.044715 * h ** 3)))
    logits = h @ w2 + b2
    lse = jax.scipy.special.logsumexp(logits, axis=-1)
    label_logit = jnp.take_along_axis(logits, labels[:, None], axis=-1)[:, 0]
    loss = jnp.mean(lse - label_logit)
    return logits, loss


if __name__ == "__main__":
    # Small, deterministic synthetic config.
    B, S, V, D, H, C = 8, 16, 64, 32, 64, 4

    key = jax.random.PRNGKey(0)
    k_emb, k_w1, k_b1, k_w2, k_b2, k_ids, k_lbl = jax.random.split(key, 7)

    params = {
        "emb": jax.random.normal(k_emb, (V, D), jnp.float32) * 0.1,
        "w1":  jax.random.normal(k_w1, (D, H), jnp.float32) * 0.1,
        "b1":  jax.random.normal(k_b1, (H,), jnp.float32) * 0.01,
        "w2":  jax.random.normal(k_w2, (H, C), jnp.float32) * 0.1,
        "b2":  jax.random.normal(k_b2, (C,), jnp.float32) * 0.01,
    }

    # tokens = {'input_ids': ..., 'labels': ...}
    input_ids = jax.random.randint(k_ids, (B, S), 0, V, dtype=jnp.int32)
    labels = jax.random.randint(k_lbl, (B,), 0, C, dtype=jnp.int32)

    out = classifier_forward(input_ids, labels, params)
    jax.block_until_ready(out)

    ref_logits, ref_loss = _ref_forward(input_ids, labels, params)
    # bf16 MXU operands in the kernel vs f32 reference -> slightly loose tols.
    assert out["logits"].shape == ref_logits.shape
    assert jnp.allclose(out["logits"], ref_logits, atol=5e-3, rtol=1e-2)
    assert jnp.allclose(out["loss"], ref_loss, atol=5e-3, rtol=1e-2)

    print("KERNEL_OK")
</pallas_src>

<mosaic_0001>
module attributes {stable_mosaic.version = 11 : i64} {
  func.func @classifier_kernel(%arg0: i32, %arg1: i32, %arg2: memref<8x8x32xbf16, #tpu.memory_space<vmem>>, %arg3: memref<32x128xbf16, #tpu.memory_space<vmem>>, %arg4: memref<1x128xf32, #tpu.memory_space<vmem>>, %arg5: memref<128x128xbf16, #tpu.memory_space<vmem>>, %arg6: memref<1x128xf32, #tpu.memory_space<vmem>>, %arg7: memref<8x1xi32, #tpu.memory_space<vmem>>, %arg8: memref<8x128xf32, #tpu.memory_space<vmem>>, %arg9: memref<8x128xf32, #tpu.memory_space<vmem>>, %arg10: memref<8x32xf32, #tpu.memory_space<vmem>>) attributes {dimension_semantics = [#tpu.dimension_semantics<parallel>, #tpu.dimension_semantics<arbitrary>], iteration_bounds = array<i64: 1, 2>, scalar_prefetch = 0 : i64, scratch_operands = 1 : i64, tpu.core_type = #tpu.core_type<tc>, window_params = [{transform_indices = @transform_0, window_bounds = array<i64: 8, 8, 32>}, {pipeline_mode = #tpu.pipeline_mode<synchronous>, transform_indices = @transform_1, window_bounds = array<i64: 32, 128>}, {pipeline_mode = #tpu.pipeline_mode<synchronous>, transform_indices = @transform_2, window_bounds = array<i64: 1, 128>}, {pipeline_mode = #tpu.pipeline_mode<synchronous>, transform_indices = @transform_3, window_bounds = array<i64: 128, 128>}, {pipeline_mode = #tpu.pipeline_mode<synchronous>, transform_indices = @transform_4, window_bounds = array<i64: 1, 128>}, {transform_indices = @transform_5, window_bounds = array<i64: 8, 1>}, {transform_indices = @transform_6, window_bounds = array<i64: 8, 128>}, {transform_indices = @transform_7, window_bounds = array<i64: 8, 128>}]} {
    %c0_i32 = arith.constant 0 : i32
    %0 = arith.cmpi eq, %arg1, %c0_i32 : i32
    %1 = arith.extui %0 : i1 to i32
    %c0_i32_0 = arith.constant 0 : i32
    %2 = arith.cmpi ne, %1, %c0_i32_0 : i32
    scf.if %2 {
      %cst_8 = arith.constant 0.000000e+00 : f32
      %12 = vector.broadcast %cst_8 : f32 to vector<8x32xf32>
      %c0_9 = arith.constant 0 : index
      %c0_10 = arith.constant 0 : index
      %13 = vector.load %arg10[%c0_9, %c0_10] : memref<8x32xf32, #tpu.memory_space<vmem>>, vector<8x32xf32>
      tpu.vector_store %arg10[%c0_9, %c0_10], %12 {strides = array<i32>} : memref<8x32xf32, #tpu.memory_space<vmem>>, vector<8x32xf32>,
    } else {
    }
    %c0 = arith.constant 0 : index
    %c0_1 = arith.constant 0 : index
    %3 = vector.load %arg10[%c0, %c0_1] : memref<8x32xf32, #tpu.memory_space<vmem>>, vector<8x32xf32>
    %c0_2 = arith.constant 0 : index
    %c0_3 = arith.constant 0 : index
    %c0_4 = arith.constant 0 : index
    %4 = vector.load %arg2[%c0_2, %c0_3, %c0_4] : memref<8x8x32xbf16, #tpu.memory_space<vmem>>, vector<8x8x32xbf16>
    %5 = arith.extf %4 : vector<8x8x32xbf16> to vector<8x8x32xf32>
    %cst = arith.constant dense<0.000000e+00> : vector<8x32xf32>
    %6 = vector.multi_reduction <add>, %5, %cst [1] : vector<8x8x32xf32> to vector<8x32xf32>
    %7 = arith.addf %3, %6 : vector<8x32xf32>
    %c0_5 = arith.constant 0 : index
    %c0_6 = arith.constant 0 : index
    %8 = vector.load %arg10[%c0_5, %c0_6] : memref<8x32xf32, #tpu.memory_space<vmem>>, vector<8x32xf32>
    tpu.vector_store %arg10[%c0_5, %c0_6], %7 {strides = array<i32>} : memref<8x32xf32, #tpu.memory_space<vmem>>, vector<8x32xf32>,
    %c1_i32 = arith.constant 1 : i32
    %9 = arith.cmpi eq, %arg1, %c1_i32 : i32
    %10 = arith.extui %9 : i1 to i32
    %c0_i32_7 = arith.constant 0 : i32
    %11 = arith.cmpi ne, %10, %c0_i32_7 : i32
    scf.if %11 {
      %c0_8 = arith.constant 0 : index
      %c0_9 = arith.constant 0 : index
      %12 = vector.load %arg10[%c0_8, %c0_9] : memref<8x32xf32, #tpu.memory_space<vmem>>, vector<8x32xf32>
      %cst_10 = arith.constant 6.250000e-02 : f32
      %13 = vector.broadcast %cst_10 : f32 to vector<8x32xf32>
      %14 = arith.mulf %12, %13 : vector<8x32xf32>
      %15 = arith.truncf %14 : vector<8x32xf32> to vector<8x32xbf16>
      %c0_11 = arith.constant 0 : index
      %c0_12 = arith.constant 0 : index
      %16 = vector.load %arg3[%c0_11, %c0_12] : memref<32x128xbf16, #tpu.memory_space<vmem>>, vector<32x128xbf16>
      %cst_13 = arith.constant dense<0.000000e+00> : vector<8x128xf32>
      %17 = tpu.matmul %15, %16, %cst_13 {dimension_numbers = #tpu.dot_dimension_numbers<[1], [0], [0], [1], [0, 0, 1, 1], [], []>} : vector<8x32xbf16>, vector<32x128xbf16>, vector<8x128xf32> -> vector<8x128xf32>
      %c0_14 = arith.constant 0 : index
      %c0_15 = arith.constant 0 : index
      %18 = vector.load %arg4[%c0_14, %c0_15] : memref<1x128xf32, #tpu.memory_space<vmem>>, vector<1x128xf32>
      %19 = vector.broadcast %18 : vector<1x128xf32> to vector<8x128xf32>
      %20 = arith.addf %17, %19 : vector<8x128xf32>
      %21 = arith.mulf %20, %20 : vector<8x128xf32>
      %cst_16 = arith.constant 5.000000e-01 : f32
      %22 = vector.broadcast %cst_16 : f32 to vector<8x128xf32>
      %23 = arith.mulf %22, %20 : vector<8x128xf32>
      %24 = arith.mulf %21, %20 : vector<8x128xf32>
      %cst_17 = arith.constant 4.471500e-02 : f32
      %25 = vector.broadcast %cst_17 : f32 to vector<8x128xf32>
      %26 = arith.mulf %25, %24 : vector<8x128xf32>
      %27 = arith.addf %20, %26 : vector<8x128xf32>
      %cst_18 = arith.constant 0.797884583 : f32
      %28 = vector.broadcast %cst_18 : f32 to vector<8x128xf32>
      %29 = arith.mulf %28, %27 : vector<8x128xf32>
      %30 = math.tanh %29 : vector<8x128xf32>
      %cst_19 = arith.constant 1.000000e+00 : f32
      %31 = vector.broadcast %cst_19 : f32 to vector<8x128xf32>
      %32 = arith.addf %31, %30 : vector<8x128xf32>
      %33 = arith.mulf %23, %32 : vector<8x128xf32>
      %34 = arith.truncf %33 : vector<8x128xf32> to vector<8x128xbf16>
      %c0_20 = arith.constant 0 : index
      %c0_21 = arith.constant 0 : index
      %35 = vector.load %arg5[%c0_20, %c0_21] : memref<128x128xbf16, #tpu.memory_space<vmem>>, vector<128x128xbf16>
      %cst_22 = arith.constant dense<0.000000e+00> : vector<8x128xf32>
      %36 = tpu.matmul %34, %35, %cst_22 {dimension_numbers = #tpu.dot_dimension_numbers<[1], [0], [0], [1], [0, 0, 1, 1], [], []>} : vector<8x128xbf16>, vector<128x128xbf16>, vector<8x128xf32> -> vector<8x128xf32>
      %c0_23 = arith.constant 0 : index
      %c0_24 = arith.constant 0 : index
      %37 = vector.load %arg6[%c0_23, %c0_24] : memref<1x128xf32, #tpu.memory_space<vmem>>, vector<1x128xf32>
      %38 = vector.broadcast %37 : vector<1x128xf32> to vector<8x128xf32>
      %39 = arith.addf %36, %38 : vector<8x128xf32>
      %c0_25 = arith.constant 0 : index
      %c0_26 = arith.constant 0 : index
      %40 = vector.load %arg8[%c0_25, %c0_26] : memref<8x128xf32, #tpu.memory_space<vmem>>, vector<8x128xf32>
      tpu.vector_store %arg8[%c0_25, %c0_26], %39 {strides = array<i32>} : memref<8x128xf32, #tpu.memory_space<vmem>>, vector<8x128xf32>,
      %41 = tpu.iota {dimensions = array<i32: 1>} : vector<8x128xi32>
      %c4_i32 = arith.constant 4 : i32
      %42 = vector.broadcast %c4_i32 : i32 to vector<8x128xi32>
      %43 = arith.cmpi slt, %41, %42 : vector<8x128xi32>
      %cst_27 = arith.constant -1.000000e+30 : f32
      %44 = vector.broadcast %cst_27 : f32 to vector<8x128xf32>
      %45 = arith.select %43, %39, %44 : vector<8x128xi1>, vector<8x128xf32>
      %cst_28 = arith.constant dense<0xFF800000> : vector<8xf32>
      %46 = vector.multi_reduction <maximumf>, %45, %cst_28 [1] : vector<8x128xf32> to vector<8xf32>
      %47 = vector.shape_cast %46 : vector<8xf32> to vector<8x1xf32>
      %48 = vector.broadcast %47 : vector<8x1xf32> to vector<8x128xf32>
      %49 = arith.subf %45, %48 : vector<8x128xf32>
      %50 = math.exp %49 : vector<8x128xf32>
      %cst_29 = arith.constant dense<0.000000e+00> : vector<8xf32>
      %51 = vector.multi_reduction <add>, %50, %cst_29 [1] : vector<8x128xf32> to vector<8xf32>
      %52 = vector.shape_cast %51 : vector<8xf32> to vector<8x1xf32>
      %53 = math.log %52 : vector<8x1xf32>
      %54 = arith.addf %53, %47 : vector<8x1xf32>
      %c0_30 = arith.constant 0 : index
      %c0_31 = arith.constant 0 : index
      %55 = vector.load %arg7[%c0_30, %c0_31] : memref<8x1xi32, #tpu.memory_space<vmem>>, vector<8x1xi32>
      %56 = vector.broadcast %55 : vector<8x1xi32> to vector<8x128xi32>
      %57 = arith.cmpi eq, %41, %56 : vector<8x128xi32>
      %58 = arith.extui %57 : vector<8x128xi1> to vector<8x128xi32>
      %59 = arith.sitofp %58 : vector<8x128xi32> to vector<8x128xf32>
      %60 = arith.mulf %39, %59 : vector<8x128xf32>
      %cst_32 = arith.constant dense<0.000000e+00> : vector<8xf32>
      %61 = vector.multi_reduction <add>, %60, %cst_32 [1] : vector<8x128xf32> to vector<8xf32>
      %62 = vector.shape_cast %61 : vector<8xf32> to vector<8x1xf32>
      %63 = arith.subf %54, %62 : vector<8x1xf32>
      %64 = vector.shape_cast %63 : vector<8x1xf32> to vector<8x1xf32>
      %65 = vector.broadcast %64 : vector<8x1xf32> to vector<8x128xf32>
      %c0_33 = arith.constant 0 : index
      %c0_34 = arith.constant 0 : index
      %66 = vector.load %arg9[%c0_33, %c0_34] : memref<8x128xf32, #tpu.memory_space<vmem>>, vector<8x128xf32>
      tpu.vector_store %arg9[%c0_33, %c0_34], %65 {strides = array<i32>} : memref<8x128xf32, #tpu.memory_space<vmem>>, vector<8x128xf32>,
    } else {
    }
    return
  }
  func.func @transform_0(%arg0: i32, %arg1: i32) -> (i32, i32, i32) {
    %c0_i32 = arith.constant 0 : i32
    %c0_i32_0 = arith.constant 0 : i32
    return %arg0, %arg1, %c0_i32 : i32, i32, i32
  }
  func.func @transform_1(%arg0: i32, %arg1: i32) -> (i32, i32) {
    %c0_i32 = arith.constant 0 : i32
    %c0_i32_0 = arith.constant 0 : i32
    %c0_i32_1 = arith.constant 0 : i32
    return %c0_i32, %c0_i32_0 : i32, i32
  }
  func.func @transform_2(%arg0: i32, %arg1: i32) -> (i32, i32) {
    %c0_i32 = arith.constant 0 : i32
    %c0_i32_0 = arith.constant 0 : i32
    %c0_i32_1 = arith.constant 0 : i32
    return %c0_i32, %c0_i32_0 : i32, i32
  }
  func.func @transform_3(%arg0: i32, %arg1: i32) -> (i32, i32) {
    %c0_i32 = arith.constant 0 : i32
    %c0_i32_0 = arith.constant 0 : i32
    %c0_i32_1 = arith.constant 0 : i32
    return %c0_i32, %c0_i32_0 : i32, i32
  }
  func.func @transform_4(%arg0: i32, %arg1: i32) -> (i32, i32) {
    %c0_i32 = arith.constant 0 : i32
    %c0_i32_0 = arith.constant 0 : i32
    %c0_i32_1 = arith.constant 0 : i32
    return %c0_i32, %c0_i32_0 : i32, i32
  }
  func.func @transform_5(%arg0: i32, %arg1: i32) -> (i32, i32) {
    %c0_i32 = arith.constant 0 : i32
    %c0_i32_0 = arith.constant 0 : i32
    return %arg0, %c0_i32 : i32, i32
  }
  func.func @transform_6(%arg0: i32, %arg1: i32) -> (i32, i32) {
    %c0_i32 = arith.constant 0 : i32
    %c0_i32_0 = arith.constant 0 : i32
    return %arg0, %c0_i32 : i32, i32
  }
  func.func @transform_7(%arg0: i32, %arg1: i32) -> (i32, i32) {
    %c0_i32 = arith.constant 0 : i32
    %c0_i32_0 = arith.constant 0 : i32
    return %arg0, %c0_i32 : i32, i32
  }
}

</mosaic_0001>

<bundles_post_ra>
// kernel: tpu_custom_call.1
= control target key start
LH: loop header
LB: loop body
LE: loop exit
PB: predicated region body
PF: predicated region fallthrough
CT: control target
= control target key end

     0   :  { %s1390_s0 = inlined_call_operand.hbm [shape: bf16[8,16,32], index: 0, kind: input, shape index: {}]   ;;  %s1391_s1 = inlined_call_operand.hbm [shape: bf16[32,128], index: 1, kind: input, shape index: {}]   ;;  %s1392_s2 = inlined_call_operand.vmem [shape: f32[1,128], index: 2, kind: input, shape index: {}]   ;;  %s1393_s3 = inlined_call_operand.hbm [shape: bf16[128,128], index: 3, kind: input, shape index: {}]   ;;  %s1394_s4 = inlined_call_operand.vmem [shape: f32[1,128], index: 4, kind: input, shape index: {}]   ;;  %s1395_s5 = inlined_call_operand.vmem [shape: s32[8,1], index: 5, kind: input, shape index: {}]   ;;  %s1396_s6 = inlined_call_operand.hbm [shape: f32[8,128], index: 6, kind: output, shape index: {0}]   ;;  %s1397_s7 = inlined_call_operand.hbm [shape: f32[8,128], index: 7, kind: output, shape index: {1}]  }
   0x1   :  { %1401 = sst [smem:[#allocation16_spill]] %s1391_s1 }
   0x2   :  { %1402 = sst [smem:[#allocation17_spill]] %s1393_s3 }
   0x3   :  { %13 = vsyncpa [#allocation4], 0 }
   0x4   :  { %15 = vsyncpa [#allocation4 + $0x1], 0 }
   0x5   :  { %16 = vsyncpa [#allocation7], 0 }
   0x6   :  { %17 = vsyncpa [#allocation5], 0 }
   0x7   :  { %18 = vsyncpa [#allocation11], 0  ;;  %s1222_s24 = smov 0   ;;  %s1224_s25 = smov 0  }
   0x8   :  { %s1226_s26 = smov 0   ;;  %s1228_s27 = smov 0  }
   0x9   :  { %s1230_s28 = smov 0   ;;  %s1232_s29 = smov 0  }
   0xa LB: > { %s1398_s30 = sadd.s32 4294967295, %s1170_s29   ;;  %p58_p0 = scmp.ne.s32.totalorder %s1154_s25, %s1150_s24  ;;  %s1170_s29 = sphi %s1232_s29, %s24_s29   ;;  %s1166_s28 = sphi %s1230_s28, %s1417_s28   ;;  %s1162_s27 = sphi %s1228_s27, %s1416_s27   ;;  %s1158_s26 = sphi %s1226_s26, %s1415_s26   ;;  %s1154_s25 = sphi %s1224_s25, %s1414_s25   ;;  %s1150_s24 = sphi %s1222_s24, %s1413_s24  }
   0xb   : > { %p1254_p1 = scmp.eq.s32.totalorder %s1398_s30, 0  ;;  %p767_p2 = scmp.ge.s32.totalorder %s1170_s29, 1 }
   0xc   : > { %p231_p3 = scmp.lt.s32.totalorder %s1170_s29, 3  ;;  %s1405_s1 = sld [smem:[#allocation16_spill]] }
   0xd   : > { %p1262_p4 = por %p1254_p1, %p58_p0  ;;  %s1172_s14 = smov [#allocation6]  }
   0xe   : > { %p1269_p5 = pnand %p767_p2, %p231_p3  ;;  %s244_s15 = sshll.u32 %s1172_s14, 4  ;;  %s245_s15 = int_to_ptr.vmem [resolvable:$true] %s244_s15 }
   0xf   : > { %s1407_s3 = sld [smem:[#allocation17_spill]]  ;;  %s1399_s19 = smov 64  }
  0x10   : > { %p875_p6 = pneg %p1269_p5  ;;  %s1400_s20 = smov 4  }
  0x11   : > { %s1175_s21 = smov [#allocation8]   ;;  %s33_s23 = sadd.s32 1, %s1166_s28 }
  0x12   : > { %s242_s12 = sshll.u32 %s1405_s1, 4  ;;  %p876_p7 = pnand %p875_p6, %p1254_p1  ;;  %s243_s12 = int_to_ptr.hbm [resolvable:$true] %s242_s12 }
  0x13   : > { %s261_s22 = sshll.u32 %s1175_s21, 4  ;;  %s45_s24 = sadd.s32 1, %s1158_s26  ;;  %s262_s22 = int_to_ptr.vmem [resolvable:$true] %s261_s22 }
  0x14   : > { %878 = dma.hbm_to_vmem [thread:$0]  (!%p876_p7), %s243_s12, 256, %s245_s15, [#allocation7], %s1399_s19, %s1399_s19, %s1400_s20  }
  0x15   : > { %s259_s18 = sshll.u32 %s1407_s3, 4  ;;  %p34_p8 = scmp.ge.s32.totalorder %s33_s23, 2  ;;  %s260_s18 = int_to_ptr.hbm [resolvable:$true] %s259_s18 }
  0x16   : > { %881 = dma.hbm_to_vmem [thread:$0]  (!%p876_p7), %s260_s18, 1024, %s262_s22, [#allocation7], %s1399_s19, %s1399_s19, %s1400_s20  }
  0x17   : > { %p52_p9 = scmp.ne.s32.totalorder %s1158_s26, %s1154_s25  ;;  %p53_p10 = scmp.eq.s32.totalorder %s1170_s29, 0 }
  0x18   : > { %p888_p11 = scmp.lt.s32.totalorder %s1170_s29, 2  ;;  %s1419_s23 = smov (%p34_p8, %s33_s23), 0 }
  0x19   : > { %p1294_p12 = por %p53_p10, %p52_p9  ;;  %s285_s11 = sand.u32 1, %s1158_s26  }
  0x1a   : > { %s41_s12 = ssub.s32 %s1166_s28, %s1419_s23  ;;  %s772_s14 = sshll.u32 %s285_s11, 5 }
  0x1b   : > { %p43_p13 = scmp.eq.s32.totalorder %s41_s12, 0  ;;  %s773_s15 = sshll.u32 %s1166_s28, 2 }
  0x1c   : > { %s296_s21 = scalar_lea.hbm %s1390_s0, %s773_s15  ;;  %s289_s22 = scalar_lea.vmem [#allocation3], %s772_s14 }
  0x1d   : > { %s1303_s16 = scalar_select %p43_p13, %s1158_s26, %s45_s24  }
  0x1e   : > { %s299_s30 = sshll.u32 %s289_s22, 4  ;;  %s297_s19 = sshll.u32 %s296_s21, 4  ;;  %s300_s30 = int_to_ptr.vmem [resolvable:$true] %s299_s30  ;;  %s298_s19 = int_to_ptr.hbm [resolvable:$true] %s297_s19 }
  0x1f   : > { %p883_p0 = pnand %p888_p11, %p1294_p12  ;;  %s286_s20 = scalar_lea.sflag [#allocation4], %s285_s11 }
  0x20   : > { %s1176_s1 = smov 128   ;;  %s1409_s3 = smov 4  }
  0x21   : > { %s1410_s12 = smov 64   ;;  %311 = sbr.rel (%p1269_p5) target bundleno = 635 (0x27b), region = 44 }
  0x22   : > { %885 = dma.hbm_to_vmem [thread:$0]  (!%p883_p0), %s298_s19, 512, %s300_s30, %s286_s20, %s1176_s1, %s1410_s12, %s1409_s3  }
  0x23   : > { %s313_s24 = sand.u32 (!%p1269_p5), 1, %s1154_s25  }
  0x24   : > { %s775_s15 = sshll.u32 (!%p1269_p5), %s313_s24, 5  ;;  %s314_s14 = scalar_lea.sflag (!%p1269_p5), [#allocation4], %s313_s24 }
  0x25   : > { %s317_s17 = scalar_lea.vmem (!%p1269_p5), [#allocation3], %s775_s15 }
  0x26   : > { %1133 = dma.done.wait (%p1262_p4), %s314_s14, 512  }
  0x27   : > { %1135 = vsyncadd (%p1262_p4), %s314_s14, 4294966784 }
  0x28   : > { %1137 = dma.done.wait (%p1254_p1), [#allocation7], 1280  }
  0x29   : > { %1139 = vsyncadd (%p1254_p1), [#allocation7], 4294966016  ;;  %p778_p2 = scmp.ne.s32.totalorder %s1162_s27, 0 }
  0x2b   : > { %367 = sbr.rel (%p778_p2) target bundleno = 50 (0x32), region = 60 }
  0x30   : > { %vm368_vm0 = vcmask 261120   ;;  %v1177_v0 = vmov 0.0  }
  0x31   : > { %369 = vst.msk [vmem:[#allocation2] sm:$0xff] %vm368_vm0, %v1177_v0 }
  0x32 PF: > { %v839_v1 = vld [vmem:[%s317_s17] sm:$0xff]   ;;  %v854_v2 = vld [vmem:[%s317_s17 + $0x8] sm:$0xff]   ;;  %vm387_vm1 = vcmask 261120   ;;  %v855_v7 = vld [vmem:[%s317_s17 + $0x10] sm:$0xff]   ;;  %vm452_vm2 = vcmask 1041409   ;;  %vm454_vm3 = vcmask 1042434  }
  0x33   : > { %v840_v3 = vunpack.c.l.bf16 %v839_v1  ;;  %v841_v4 = vunpack.c.h.bf16 %v839_v1  ;;  %v844_v5 = vunpack.c.l.bf16 %v854_v2  ;;  %v845_v6 = vunpack.c.h.bf16 %v854_v2  ;;  %v856_v8 = vld [vmem:[%s317_s17 + $0x18] sm:$0xff]   ;;  %p779_p1 = scmp.ne.s32.totalorder %s1162_s27, 1 }
  0x34   : > { %v848_v9 = vunpack.c.l.bf16 %v855_v7  ;;  %v849_v10 = vunpack.c.h.bf16 %v855_v7  ;;  %v852_v11 = vunpack.c.l.bf16 %v856_v8  ;;  %v853_v12 = vunpack.c.h.bf16 %v856_v8 }
  0x35   : > { %v388_v13 = vsel %vm387_vm1, %v840_v3, 0.0  ;;  %v395_v14 = vsel %vm387_vm1, %v841_v4, 0.0  ;;  %v402_v15 = vsel %vm387_vm1, %v844_v5, 0.0  ;;  %v409_v16 = vsel %vm387_vm1, %v845_v6, 0.0 }
  0x36   : > { %v389_v17 = vrot.slane %v388_v13, 4  ;;  %v396_v18 = vrot.slane %v395_v14, 4  ;;  %v403_v19 = vrot.slane %v402_v15, 4  ;;  %v410_v20 = vrot.slane %v409_v16, 4 }
  0x37   : > { %v416_v21 = vsel %vm387_vm1, %v848_v9, 0.0  ;;  %v423_v22 = vsel %vm387_vm1, %v849_v10, 0.0  ;;  %v430_v23 = vsel %vm387_vm1, %v852_v11, 0.0  ;;  %v437_v24 = vsel %vm387_vm1, %v853_v12, 0.0 }
  0x38   : > { %v390_v25 = vadd.f32 %v389_v17, %v388_v13  ;;  %v397_v26 = vadd.f32 %v396_v18, %v395_v14  ;;  %v404_v27 = vadd.f32 %v403_v19, %v402_v15  ;;  %v411_v28 = vadd.f32 %v410_v20, %v409_v16  ;;  %v370_v9 = vld [vmem:[#allocation2] sm:$0xff] }
  0x39   : > { %v417_v29 = vrot.slane %v416_v21, 4  ;;  %v424_v30 = vrot.slane %v423_v22, 4  ;;  %v431_v31 = vrot.slane %v430_v23, 4  ;;  %v438_v32 = vrot.slane %v437_v24, 4 }
  0x3a   : > { %v391_v33 = vrot.slane %v390_v25, 2  ;;  %v398_v34 = vrot.slane %v397_v26, 2  ;;  %v405_v35 = vrot.slane %v404_v27, 2  ;;  %v412_v36 = vrot.slane %v411_v28, 2 }
  0x3b   : > { %v418_v37 = vadd.f32 %v417_v29, %v416_v21  ;;  %v425_v38 = vadd.f32 %v424_v30, %v423_v22  ;;  %v432_v39 = vadd.f32 %v431_v31, %v430_v23  ;;  %v439_v40 = vadd.f32 %v438_v32, %v437_v24 }
  0x3c   : > { %v392_v41 = vadd.f32 %v391_v33, %v390_v25  ;;  %v399_v42 = vadd.f32 %v398_v34, %v397_v26  ;;  %v406_v43 = vadd.f32 %v405_v35, %v404_v27  ;;  %v413_v44 = vadd.f32 %v412_v36, %v411_v28 }
  0x3d   : > { %v419_v45 = vrot.slane %v418_v37, 2  ;;  %v426_v46 = vrot.slane %v425_v38, 2  ;;  %v433_v47 = vrot.slane %v432_v39, 2  ;;  %v440_v48 = vrot.slane %v439_v40, 2 }
  0x3e   : > { %v393_v49 = vrot.slane %v392_v41, 1  ;;  %v400_v50 = vrot.slane %v399_v42, 1  ;;  %v407_v51 = vrot.slane %v406_v43, 1  ;;  %v414_v52 = vrot.slane %v413_v44, 1 }
  0x3f   : > { %v420_v53 = vadd.f32 %v419_v45, %v418_v37  ;;  %v427_v54 = vadd.f32 %v426_v46, %v425_v38  ;;  %v434_v55 = vadd.f32 %v433_v47, %v432_v39  ;;  %v441_v56 = vadd.f32 %v440_v48, %v439_v40 }
  0x40   : > { %v394_v57 = vadd.f32 %v393_v49, %v392_v41  ;;  %v401_v58 = vadd.f32 %v400_v50, %v399_v42  ;;  %v408_v59 = vadd.f32 %v407_v51, %v406_v43  ;;  %v415_v60 = vadd.f32 %v414_v52, %v413_v44 }
  0x41   : > { %v421_v61 = vrot.slane %v420_v53, 1  ;;  %v428_v62 = vrot.slane %v427_v54, 1  ;;  %v435_v63 = vrot.slane %v434_v55, 1  ;;  %v442_v0 = vrot.slane %v441_v56, 1 }
  0x42   : > { %v453_v1 = vsel %vm452_vm2, %v401_v58, %v394_v57  ;;  %vm456_vm4 = vcmask 1043459   ;;  %vm458_vm5 = vcmask 1044484   ;;  %vm460_vm6 = vcmask 1045509  }
  0x43   : > { %v422_v2 = vadd.f32 %v421_v61, %v420_v53  ;;  %v429_v3 = vadd.f32 %v428_v62, %v427_v54  ;;  %v436_v4 = vadd.f32 %v435_v63, %v434_v55  ;;  %v455_v5 = vsel %vm454_vm3, %v408_v59, %v453_v1 }
  0x44   : > { %v443_v6 = vadd.f32 %v442_v0, %v441_v56  ;;  %v457_v7 = vsel %vm456_vm4, %v415_v60, %v455_v5  ;;  %vm462_vm7 = vcmask 1046534   ;;  %vm464_vm8 = vcmask 1047559  }
  0x45   : > { %v459_v8 = vsel %vm458_vm5, %v422_v2, %v457_v7 }
  0x46   : > { %v461_v10 = vsel %vm460_vm6, %v429_v3, %v459_v8 }
  0x47   : > { %v463_v11 = vsel %vm462_vm7, %v436_v4, %v461_v10  ;;  %472 = sbr.rel (%p779_p1) target bundleno = 625 (0x271), region = 64 }
  0x48   : > { %v465_v12 = vsel %vm464_vm8, %v443_v6, %v463_v11 }
  0x49   : > { %v467_v13 = vadd.f32 %v465_v12, %v370_v9 }
  0x4b   : > { %468 = vst.msk [vmem:[#allocation2] sm:$0xff] %vm387_vm1, %v467_v13 }
  0x4c   : > { %v829_v14 = vld [vmem:[#allocation6 + $0x8] sm:$0xff]  ;;  %v828_v18 = vld [vmem:[#allocation6] sm:$0xff]  ;;  %v835_v21 = vld [vmem:[#allocation8 + $0x28] sm:$0xff]  ;;  %v1178_v41 = vmov 0   ;;  %v604_v42 = vlaneseq  ;;  %v1179_v55 = vmov 0.0  }
  0x4d   : > { %v837_v17 = vld [vmem:[#allocation8 + $0x38] sm:$0xff]  ;;  %505 = vmatpush.bf16.msra.mxu0 %v829_v14  ;;  %v836_v19 = vld [vmem:[#allocation8 + $0x30] sm:$0xff]  ;;  %v834_v22 = vld [vmem:[#allocation8 + $0x20] sm:$0xff]  ;;  %953 = vset.pattern.permute.xlu0 %v1178_v41 }
  0x4e   : > { %590 = vmatpush.bf16.msra.mxu1 %v837_v17  ;;  %v833_v23 = vld [vmem:[#allocation8 + $0x18] sm:$0xff]  ;;  %v832_v24 = vld [vmem:[#allocation8 + $0x10] sm:$0xff]  ;;  %v831_v25 = vld [vmem:[#allocation8 + $0x8] sm:$0xff]  ;;  %v605_v43 = vand.u32 127, %v604_v42 }
  0x4f   : > { %v830_v26 = vld [vmem:[#allocation8] sm:$0xff]  ;;  %v954_v27 = vld [vmem:[%s1392_s2] ss:$0 sm:$0xff] }
  0x50   : > { %v955_v44 = vld [vmem:[%s1394_s4] ss:$0 sm:$0xff]  ;;  %vm606_vm9 = vcmp.lt.s32.totalorder %v605_v43, 4 }
  0x51   : > { %506 = vmatpush.bf16.msra.mxu0 %v828_v18  ;;  %v618_v49 = vld [vmem:[%s1395_s5] sm:$0xff] }
  0x52   : > { %v473_v15 = vld [vmem:[#allocation2] sm:$0xff]  ;;  %591 = vmatpush.bf16.msra.mxu1 %v836_v19 }
  0x53   : > { %v474_v16 = vmul.f32 0.0625, %v473_v15 }
  0x55   : > { %v475_v20 = vpack.c.bf16 %v474_v16, %v474_v16 }
  0x56   : > { %592 = vmatpush.bf16.msra.mxu1 %v835_v21 }
  0x57   : > { %788 = vmatmul.msk.bf16.vlgmr.msra.gmra.mxu0 %vm387_vm1, %v475_v20 }
  0x5a   : > { %593 = vmatpush.bf16.msra.mxu1 %v834_v22 }
  0x5e   : > { %594 = vmatpush.bf16.msra.mxu1 %v833_v23 }
  0x62   : > { %595 = vmatpush.bf16.msra.mxu1 %v832_v24 }
  0x66   : > { %596 = vmatpush.bf16.msra.mxu1 %v831_v25 }
  0x6a   : > { %597 = vmatpush.bf16.msra.mxu1 %v830_v26 }
  0xd4   : > { %v508_v28 = vpop.f32.mrf.mxu0 }
  0xd5   : > { %v509_v29 = vadd.f32 %v954_v27, %v508_v28 }
  0xd7   : > { %v512_v30 = vmul.f32 %v509_v29, %v509_v29  ;;  %v513_v37 = vmul.f32 0.5, %v509_v29 }
  0xd9   : > { %v514_v31 = vmul.f32 %v512_v30, %v509_v29 }
  0xdb   : > { %v515_v32 = vmul.f32 0.044715, %v514_v31 }
  0xdc   : > { %v510_v33 = vpop.f32.mrf.mxu0 }
  0xdd   : > { %v516_v34 = vadd.f32 %v515_v32, %v509_v29 }
  0xdf   : > { %v517_v35 = vmul.f32 0.7978846, %v516_v34 }
  0xe1   : > { %956 = vtanh.f32 %v517_v35 }
  0xe7   : > { %v957_v36 = vpop.eup %956 }
  0xe8   : > { %v519_v38 = vadd.f32 1.0, %v957_v36 }
  0xea   : > { %v520_v39 = vmul.f32 %v519_v38, %v513_v37 }
  0xec   : > { %v521_v40 = vpack.c.bf16 %v520_v39, %v520_v39 }
  0xee   : > { %598 = vmatmul.bf16.vlgmr.msra.gmra.mxu1 %v521_v40 }
 0x16b   : > { %v599_v45 = vpop.f32.mrf.mxu1 }
 0x16c   : > { %v600_v46 = vadd.f32 %v955_v44, %v599_v45 }
 0x16e   : > { %603 = vst [vmem:[#allocation9] sm:$0xff] %v600_v46  ;;  %v607_v47 = vsel %vm606_vm9, %v600_v46, -1e+30 }
 0x16f   : > { %608 = vmax.xlane.f32.xlu0 %v607_v47 }
 0x173   : > { %v601_v48 = vpop.f32.mrf.mxu1 }
 0x183   : > { %620 = vperm.xlu0 %953, %v618_v49  }
 0x1e2   : > { %v609_v50 = vpop.xlane.xlu0 %608 }
 0x1e3   : > { %v610_v51 = vsub.f32 %v607_v47, %v609_v50 }
 0x1e5   : > { %v611_v52 = vmul.f32 1.442695, %v610_v51 }
 0x1e7   : > { %958 = vpow2.f32 %v611_v52 }
 0x1ed   : > { %v959_v53 = vpop.eup %958 }
 0x1ee   : > { %613 = vadd.xlane.f32.xlu1 %v959_v53 }
 0x1f5   : > { %v621_v54 = vpop.permute.xlu0 %620 }
 0x1f6   : > { %vm622_vm10 = vcmp.eq.s32.totalorder %v605_v43, %v621_v54 }
 0x1f7   : > { %v821_v56 = vsel %vm622_vm10, 1.0, %v1179_v55 }
 0x1f8   : > { %v625_v57 = vmul.f32 %v821_v56, %v600_v46 }
 0x1fa   : > { %626 = vadd.xlane.f32.xlu1 %v625_v57 }
 0x261   : > { %v614_v58 = vpop.xlane.xlu1 %613 }
 0x262   : > { %960 = vlog2.f32 %v614_v58 }
 0x268   : > { %v961_v59 = vpop.eup %960 }
 0x269   : > { %v616_v60 = vmul.f32 0.6931472, %v961_v59 }
 0x26b   : > { %v617_v61 = vadd.f32 %v616_v60, %v609_v50 }
 0x26d   : > { %v627_v62 = vpop.xlane.xlu1 %626 }
 0x26e   : > { %v628_v63 = vsub.f32 %v617_v61, %v627_v62 }
 0x270   : > { %629 = vst [vmem:[#allocation10] sm:$0xff] %v628_v63 }
 0x271 PF: > { %s1411_s13 = sadd.s32 4294967295, %s1170_s29   ;;  %s640_s11 = sshll.u32 %s1396_s6, 4  ;;  %s641_s11 = int_to_ptr.hbm [resolvable:$true] %s640_s11 }
 0x272   : > { %p1350_p3 = scmp.eq.s32.totalorder %s1411_s13, 1  ;;  %s1180_s18 = smov [#allocation9]  }
 0x273   : > { %s638_s21 = sshll.u32 %s1180_s18, 4  ;;  %s1181_s22 = smov [#allocation10]   ;;  %s639_s21 = int_to_ptr.vmem [resolvable:$true] %s638_s21 }
 0x274   : > { %868 = dma.vmem_to_hbm [thread:$0]  (%p1350_p3), %s639_s21, 128, %s641_s11, [#allocation5]  }
 0x275   : > { %s652_s12 = sshll.u32 %s1181_s22, 4  ;;  %s654_s14 = sshll.u32 %s1397_s7, 4  ;;  %s653_s12 = int_to_ptr.vmem [resolvable:$true] %s652_s12  ;;  %s655_s14 = int_to_ptr.hbm [resolvable:$true] %s654_s14 }
 0x276   : > { %870 = dma.vmem_to_hbm [thread:$0]  (%p1350_p3), %s653_s12, 128, %s655_s14, [#allocation11]  }
 0x277   : > { %1141 = dma.done.wait (%p1350_p3), [#allocation5], 128  }
 0x278   : > { %1143 = vsyncadd (%p1350_p3), [#allocation5], 4294967168 }
 0x279   : > { %1145 = dma.done.wait (%p1350_p3), [#allocation11], 128  }
 0x27a   : > { %1147 = vsyncadd (%p1350_p3), [#allocation11], 4294967168 }
 0x27b PF: > { %s24_s29 = sadd.s32 1, %s1170_s29   ;;  %s1413_s24 = smov %s1154_s25 }
 0x27c   : > { %p21_p4 = scmp.ge.s32.totalorder %s24_s29, 4   ;;  %s1414_s25 = smov %s1158_s26 }
 0x27d   : > { %s1415_s26 = smov %s1303_s16  ;;  %s1416_s27 = smov %s1166_s28 }
 0x27e   : > { %s1417_s28 = smov %s1419_s23  ;;  %23 = sbr.rel (!%p21_p4) target bundleno = 10 (0xa), region = 110 }
 0x283   :  { %673 = vsyncpa [#allocation4], 1 }
 0x284   :  { %675 = vsyncpa [#allocation4 + $0x1], 1 }
 0x285   :  { %676 = vsyncpa [#allocation7], 1 }
 0x286   :  { %677 = vsyncpa [#allocation5], 1 }
 0x287   :  { %679 = vsyncpa [#allocation5 + $0x1], 1 }
 0x288   :  { %680 = vsyncpa [#allocation11], 1 }

</bundles_post_ra>
